<compile_context>
chip_gen: v7x
topology: tpu7x:2x2x1
jax: 0.10.0
libtpu: 0.0.40
codegen_flags: <defaults>
</compile_context>

<pallas_src>
import jax
import jax.numpy as jnp
from jax.experimental import pallas as pl
from jax.experimental.pallas import tpu as pltpu

LANE = 128
SUBLANE = 8


def _round_up(x, m):
    return ((x + m - 1) // m) * m


def _cdiv(a, b):
    return -(-a // b)


def _vmem_capacity_bytes():
    """Per-TC VMEM capacity; conservative v7x fallback if the query fails."""
    try:
        return int(pltpu.get_tpu_info().vmem_capacity_bytes)
    except Exception:
        return 64 * 1024 * 1024


def _make_head_kernel(hw_total, hw_tile, ragged_hw):
    def kernel(x_ref, w_ref, b_ref, o_ref, acc_ref):
        # x_ref: (n_tile, C, hw_tile)   w_ref: (C, K_pad)   b_ref: (1, K_pad)
        # o_ref: (n_tile, K_pad)        acc_ref: (n_tile, C) f32 scratch
        hw_step = pl.program_id(1)

        @pl.when(hw_step == 0)
        def _init():
            acc_ref[...] = jnp.zeros_like(acc_ref)

        x = x_ref[...]
        if ragged_hw:
            # Ragged spatial tail: zero the out-of-range lanes in-register
            # instead of padding x in HBM (avoids a full extra read+write of x).
            lane = jax.lax.broadcasted_iota(jnp.int32, x.shape, 2)
            valid = (hw_step * hw_tile + lane) < hw_total
            x = jnp.where(valid, x, jnp.zeros_like(x))

        # Partial global-average-pool: accumulate spatial sums (the 1/(H*W)
        # scale is folded into the weight in prepare_head_params).
        acc_ref[...] += jnp.sum(x.astype(jnp.float32), axis=-1)

        @pl.when(hw_step == pl.num_programs(1) - 1)
        def _finalize():
            pooled = acc_ref[...]                                   # (n_tile, C)
            logits = jnp.dot(pooled, w_ref[...],
                             preferred_element_type=jnp.float32,
                             precision=jax.lax.Precision.HIGHEST)   # (n_tile, K_pad)
            logits = logits + b_ref[...]
            # Exact sigmoid: finalize runs once per N block, EUP otherwise idle.
            o_ref[...] = (1.0 / (1.0 + jnp.exp(-logits))).astype(o_ref.dtype)

    return kernel


def prepare_head_params(weight, bias, pool_hw):
    """One-time (per-weight) prep: transpose to (C, K), fold the 1/(H*W) pooling
    scale into the weight, and pad the class dim to a lane-dense multiple of 128."""
    K, C = weight.shape
    K_pad = _round_up(K, LANE)
    w_t = weight.T.astype(jnp.float32) / jnp.float32(pool_hw)        # (C, K)
    w_t = jnp.pad(w_t, ((0, 0), (0, K_pad - K)))                     # (C, K_pad)
    b2 = jnp.pad(bias.astype(jnp.float32), (0, K_pad - K)).reshape(1, K_pad)
    return w_t, b2


def head_forward(x_nchw, w_prep, b_prep, num_classes):
    """x_nchw: (N, C, H, W); (w_prep, b_prep) from prepare_head_params."""
    N, C, H, W = x_nchw.shape
    HW = H * W
    K_pad = w_prep.shape[1]
    itemsize = jnp.dtype(x_nchw.dtype).itemsize

    x_flat = x_nchw.reshape(N, C, HW)        # contiguous reshape: no HBM copy

    # ---- per-chip VMEM budget for the double-buffered x stream ---------------
    vmem_cap = _vmem_capacity_bytes()
    blk_budget = (vmem_cap * 3) // 16        # per x buffer (~12 MiB v7x, ~24 MiB v5e/v6e)

    # ---- batch tiling (parallel grid axis; feeds both TCs on v7x) ------------
    if N < SUBLANE:
        # Tiny batch: single full-dim block (satisfies the (8,128) rule via the
        # "equal full array dim" escape).
        # TODO(synk): for tiny-batch inference on v7x the HW reduction could be
        # split across the 2 TensorCores (per-core partial acc + combine).
        n_tile = N
        num_n_blocks = 1
    else:
        hw_lane = _round_up(HW, LANE)
        rows_fit = (blk_budget // (C * hw_lane * itemsize) // SUBLANE) * SUBLANE
        if rows_fit >= SUBLANE:
            # Whole spatial extent fits per row-block: grow rows toward the
            # HBM-roofline sweet spot, cap at 256 (diminishing returns).
            n_cap = min(rows_fit, 256)
            if N >= 2 * SUBLANE:
                # keep >= 2 N blocks so v7x's second TensorCore has work
                n_cap = min(n_cap, _round_up(_cdiv(N, 2), SUBLANE))
            num_n_blocks = _cdiv(N, n_cap)
            n_tile = _round_up(_cdiv(N, num_n_blocks), SUBLANE)
        else:
            # Spatial extent too large even for 8 rows: split the reduction axis.
            n_tile = SUBLANE
        n_tile = min(n_tile, (N // SUBLANE) * SUBLANE)   # never exceed the array
        num_n_blocks = _cdiv(N, n_tile)                  # ragged tail = partial block

    # ---- spatial tiling (reduction grid axis, last), balanced ----------------
    max_hw = blk_budget // max(1, n_tile * C * itemsize)
    max_hw = max(LANE, (max_hw // LANE) * LANE)
    if HW <= max_hw:
        hw_tile = HW                         # full-dim block: no padding, no mask
        num_hw_blocks = 1
        ragged_hw = False
    else:
        num_hw_blocks = _cdiv(HW, max_hw)
        hw_tile = _round_up(_cdiv(HW, num_hw_blocks), LANE)
        num_hw_blocks = _cdiv(HW, hw_tile)
        ragged_hw = (HW % hw_tile) != 0      # mask the tail in-kernel

    # ---- VMEM limit from actual block bytes (+ headroom), per-chip cap -------
    x_blk = n_tile * C * hw_tile * itemsize
    w_bytes = C * K_pad * 4
    b_bytes = K_pad * 4
    o_blk = n_tile * K_pad * 4
    acc_bytes = n_tile * C * 4
    needed = 2 * (x_blk + w_bytes + b_bytes + o_blk) + acc_bytes
    vmem_limit = min(max(needed * 3 // 2 + (2 << 20), 16 << 20), (vmem_cap * 3) // 4)

    cost = pl.CostEstimate(
        flops=2 * N * C * HW + 2 * N * C * K_pad + 4 * N * K_pad,
        transcendentals=N * K_pad,
        bytes_accessed=N * C * HW * itemsize + (C + N + 1) * K_pad * 4,
    )

    kernel = _make_head_kernel(HW, hw_tile, ragged_hw)

    out_padded = pl.pallas_call(
        kernel,
        out_shape=jax.ShapeDtypeStruct((N, K_pad), jnp.float32),
        grid_spec=pltpu.PrefetchScalarGridSpec(
            num_scalar_prefetch=0,
            grid=(num_n_blocks, num_hw_blocks),
            in_specs=[
                pl.BlockSpec((n_tile, C, hw_tile), lambda ni, hi: (ni, 0, hi)),
                pl.BlockSpec((C, K_pad), lambda ni, hi: (0, 0)),
                pl.BlockSpec((1, K_pad), lambda ni, hi: (0, 0)),
            ],
            out_specs=pl.BlockSpec((n_tile, K_pad), lambda ni, hi: (ni, 0)),
            scratch_shapes=[pltpu.VMEM((n_tile, C), jnp.float32)],
        ),
        compiler_params=pltpu.CompilerParams(
            dimension_semantics=("parallel", "arbitrary"),
            vmem_limit_bytes=int(vmem_limit),
        ),
        cost_estimate=cost,
    )(x_flat, w_prep, b_prep)

    return out_padded[:, :num_classes]


if __name__ == "__main__":
    # Module config: embed_dim=4 -> Linear in_features = embed_dim * 8 = 32 channels
    embed_dim = 4
    num_classes = 3
    C = embed_dim * 8
    N, H, W = 2, 16, 16

    key = jax.random.PRNGKey(0)
    kx, kw, kb = jax.random.split(key, 3)

    x = jax.random.normal(kx, (N, C, H, W), dtype=jnp.float32)

    # Deterministic Linear init (uniform +/- 1/sqrt(fan_in), like nn.Linear default)
    bound = 1.0 / jnp.sqrt(jnp.float32(C))
    weight = jax.random.uniform(kw, (num_classes, C), minval=-bound, maxval=bound,
                                dtype=jnp.float32)
    bias = jax.random.uniform(kb, (num_classes,), minval=-bound, maxval=bound,
                              dtype=jnp.float32)

    # One-time per-weight prep, hoisted out of the per-call path.
    w_prep, b_prep = prepare_head_params(weight, bias, H * W)

    out = head_forward(x, w_prep, b_prep, num_classes)
    out = jax.block_until_ready(out)

    # Pure-JAX reference of the same math (exact sigmoid in-kernel now).
    ref = jax.nn.sigmoid(jnp.mean(x, axis=(2, 3)) @ weight.T + bias)
    assert out.shape == (N, num_classes)
    assert jnp.allclose(out, ref, atol=1e-4, rtol=1e-4), "mismatch vs reference"

    print("KERNEL_OK")
</pallas_src>

<mosaic_0001>
module attributes {stable_mosaic.version = 11 : i64} {
  func.func @kernel(%arg0: i32, %arg1: i32, %arg2: memref<2x32x256xf32, #tpu.memory_space<vmem>>, %arg3: memref<32x128xf32, #tpu.memory_space<vmem>>, %arg4: memref<1x128xf32, #tpu.memory_space<vmem>>, %arg5: memref<2x128xf32, #tpu.memory_space<vmem>>, %arg6: memref<2x32xf32, #tpu.memory_space<vmem>>) attributes {dimension_semantics = [#tpu.dimension_semantics<parallel>, #tpu.dimension_semantics<arbitrary>], iteration_bounds = array<i64: 1, 1>, scalar_prefetch = 0 : i64, scratch_operands = 1 : i64, tpu.core_type = #tpu.core_type<tc>, window_params = [{transform_indices = @transform_0, window_bounds = array<i64: 2, 32, 256>}, {pipeline_mode = #tpu.pipeline_mode<synchronous>, transform_indices = @transform_1, window_bounds = array<i64: 32, 128>}, {pipeline_mode = #tpu.pipeline_mode<synchronous>, transform_indices = @transform_2, window_bounds = array<i64: 1, 128>}, {transform_indices = @transform_3, window_bounds = array<i64: 2, 128>}]} {
    %c0_i32 = arith.constant 0 : i32
    %0 = arith.cmpi eq, %arg1, %c0_i32 : i32
    %1 = arith.extui %0 : i1 to i32
    %c0_i32_0 = arith.constant 0 : i32
    %2 = arith.cmpi ne, %1, %c0_i32_0 : i32
    scf.if %2 {
      %cst_9 = arith.constant 0.000000e+00 : f32
      %11 = vector.broadcast %cst_9 : f32 to vector<2x32xf32>
      %c0_10 = arith.constant 0 : index
      %c0_11 = arith.constant 0 : index
      %12 = vector.load %arg6[%c0_10, %c0_11] : memref<2x32xf32, #tpu.memory_space<vmem>>, vector<2x32xf32>
      tpu.vector_store %arg6[%c0_10, %c0_11], %11 {strides = array<i32>} : memref<2x32xf32, #tpu.memory_space<vmem>>, vector<2x32xf32>,
    } else {
    }
    %c0 = arith.constant 0 : index
    %c0_1 = arith.constant 0 : index
    %c0_2 = arith.constant 0 : index
    %3 = vector.load %arg2[%c0, %c0_1, %c0_2] : memref<2x32x256xf32, #tpu.memory_space<vmem>>, vector<2x32x256xf32>
    %c0_3 = arith.constant 0 : index
    %c0_4 = arith.constant 0 : index
    %4 = vector.load %arg6[%c0_3, %c0_4] : memref<2x32xf32, #tpu.memory_space<vmem>>, vector<2x32xf32>
    %cst = arith.constant dense<0.000000e+00> : vector<2x32xf32>
    %5 = vector.multi_reduction <add>, %3, %cst [2] : vector<2x32x256xf32> to vector<2x32xf32>
    %6 = arith.addf %4, %5 : vector<2x32xf32>
    %c0_5 = arith.constant 0 : index
    %c0_6 = arith.constant 0 : index
    %7 = vector.load %arg6[%c0_5, %c0_6] : memref<2x32xf32, #tpu.memory_space<vmem>>, vector<2x32xf32>
    tpu.vector_store %arg6[%c0_5, %c0_6], %6 {strides = array<i32>} : memref<2x32xf32, #tpu.memory_space<vmem>>, vector<2x32xf32>,
    %c0_i32_7 = arith.constant 0 : i32
    %8 = arith.cmpi eq, %arg1, %c0_i32_7 : i32
    %9 = arith.extui %8 : i1 to i32
    %c0_i32_8 = arith.constant 0 : i32
    %10 = arith.cmpi ne, %9, %c0_i32_8 : i32
    scf.if %10 {
      %c0_9 = arith.constant 0 : index
      %c0_10 = arith.constant 0 : index
      %11 = vector.load %arg6[%c0_9, %c0_10] : memref<2x32xf32, #tpu.memory_space<vmem>>, vector<2x32xf32>
      %c0_11 = arith.constant 0 : index
      %c0_12 = arith.constant 0 : index
      %12 = vector.load %arg3[%c0_11, %c0_12] : memref<32x128xf32, #tpu.memory_space<vmem>>, vector<32x128xf32>
      %cst_13 = arith.constant dense<0.000000e+00> : vector<2x128xf32>
      %13 = tpu.matmul %11, %12, %cst_13 {dimension_numbers = #tpu.dot_dimension_numbers<[1], [0], [0], [1], [0, 0, 1, 1], [], []>, precision = #tpu.contract_precision<fp32>} : vector<2x32xf32>, vector<32x128xf32>, vector<2x128xf32> -> vector<2x128xf32>
      %c0_14 = arith.constant 0 : index
      %c0_15 = arith.constant 0 : index
      %14 = vector.load %arg4[%c0_14, %c0_15] : memref<1x128xf32, #tpu.memory_space<vmem>>, vector<1x128xf32>
      %15 = vector.broadcast %14 : vector<1x128xf32> to vector<2x128xf32>
      %16 = arith.addf %13, %15 : vector<2x128xf32>
      %cst_16 = arith.constant 0.000000e+00 : f32
      %17 = vector.broadcast %cst_16 : f32 to vector<2x128xf32>
      %18 = arith.subf %17, %16 : vector<2x128xf32>
      %19 = math.exp %18 : vector<2x128xf32>
      %cst_17 = arith.constant 1.000000e+00 : f32
      %20 = vector.broadcast %cst_17 : f32 to vector<2x128xf32>
      %21 = arith.addf %20, %19 : vector<2x128xf32>
      %cst_18 = arith.constant 1.000000e+00 : f32
      %22 = vector.broadcast %cst_18 : f32 to vector<2x128xf32>
      %23 = arith.divf %22, %21 : vector<2x128xf32>
      %c0_19 = arith.constant 0 : index
      %c0_20 = arith.constant 0 : index
      %24 = vector.load %arg5[%c0_19, %c0_20] : memref<2x128xf32, #tpu.memory_space<vmem>>, vector<2x128xf32>
      tpu.vector_store %arg5[%c0_19, %c0_20], %23 {strides = array<i32>} : memref<2x128xf32, #tpu.memory_space<vmem>>, vector<2x128xf32>,
    } else {
    }
    return
  }
  func.func @transform_0(%arg0: i32, %arg1: i32) -> (i32, i32, i32) {
    %c0_i32 = arith.constant 0 : i32
    %c0_i32_0 = arith.constant 0 : i32
    return %arg0, %c0_i32, %arg1 : i32, i32, i32
  }
  func.func @transform_1(%arg0: i32, %arg1: i32) -> (i32, i32) {
    %c0_i32 = arith.constant 0 : i32
    %c0_i32_0 = arith.constant 0 : i32
    %c0_i32_1 = arith.constant 0 : i32
    return %c0_i32, %c0_i32_0 : i32, i32
  }
  func.func @transform_2(%arg0: i32, %arg1: i32) -> (i32, i32) {
    %c0_i32 = arith.constant 0 : i32
    %c0_i32_0 = arith.constant 0 : i32
    %c0_i32_1 = arith.constant 0 : i32
    return %c0_i32, %c0_i32_0 : i32, i32
  }
  func.func @transform_3(%arg0: i32, %arg1: i32) -> (i32, i32) {
    %c0_i32 = arith.constant 0 : i32
    %c0_i32_0 = arith.constant 0 : i32
    return %arg0, %c0_i32 : i32, i32
  }
}

</mosaic_0001>

<bundles_post_ra>
// kernel: tpu_custom_call.1
= control target key start
LH: loop header
LB: loop body
LE: loop exit
PB: predicated region body
PF: predicated region fallthrough
CT: control target
= control target key end

     0   :  { %8 = vsyncpa [#allocation4], 0  ;;  %s1041_s0 = inlined_call_operand.hbm [shape: f32[2,32,256], index: 0, kind: input, shape index: {}]   ;;  %s1042_s1 = inlined_call_operand.hbm [shape: f32[32,128], index: 1, kind: input, shape index: {}]   ;;  %s1043_s2 = inlined_call_operand.vmem [shape: f32[1,128], index: 2, kind: input, shape index: {}]   ;;  %s1044_s3 = inlined_call_operand.hbm [shape: f32[2,128], index: 3, kind: output, shape index: {}]  }
   0x1   :  { %9 = vsyncpa [#allocation7], 0 }
   0x2   :  { %10 = vsyncpa [#allocation5], 0  ;;  %s906_s12 = smov [#allocation3]   ;;  %s834_s16 = scalar_lea.hbm %s1041_s0, 2048 }
   0x3   :  { %s16_s13 = sshll.u32 %s906_s12, 4  ;;  %p835_p0 = scmp.ne.s32.totalorder %s1041_s0, %s834_s16  ;;  %s17_s13 = int_to_ptr.vmem [resolvable:$true] %s16_s13 }
   0x4   :  { %p838_p1 = scmp.lt.u32.totalorder %s834_s16, %s1041_s0 }
   0x6   :  { %p840_p2 = pnand %p838_p1, %p835_p0 }
   0x8   :  { %843 = shalt.err (!%p840_p2)
}
   0x9   :  { %s844_s21 = scalar_lea.vmem %s17_s13, 2048  ;;  %p849_p4 = scmp.lt.s32.totalorder %s17_s13, %s17_s13 }
   0xa   :  { %p845_p3 = scmp.ne.s32.totalorder %s17_s13, %s844_s21  ;;  %p850_p5 = scmp.lt.s32.totalorder %s844_s21, %s844_s21 }
   0xc   :  { %p851_p6 = por %p850_p5, %p849_p4 }
   0xe   :  { %p852_p7 = pnand %p851_p6, %p845_p3 }
  0x10   :  { %855 = shalt.err (!%p852_p7)
}
  0x11   :  { %s907_s22 = smov 256   ;;  %s908_s23 = smov 16  }
  0x12   :  { %22 = dma.hbm_to_vmem [thread:$0]  %s1041_s0, 2048, %s17_s13, [#allocation4], %s907_s22, %s907_s22, %s908_s23  }
  0x13   :  { %s909_s26 = smov [#allocation6]   ;;  %s856_s30 = scalar_lea.hbm %s1042_s1, 512 }
  0x14   :  { %s28_s27 = sshll.u32 %s909_s26, 4  ;;  %p857_p8 = scmp.ne.s32.totalorder %s1042_s1, %s856_s30  ;;  %s29_s27 = int_to_ptr.vmem [resolvable:$true] %s28_s27 }
  0x15   :  { %p860_p9 = scmp.lt.u32.totalorder %s856_s30, %s1042_s1 }
  0x17   :  { %p862_p10 = pnand %p860_p9, %p857_p8 }
  0x19   :  { %865 = shalt.err (!%p862_p10)
}
  0x1a   :  { %s866_s8 = scalar_lea.vmem %s29_s27, 512  ;;  %p871_p12 = scmp.lt.s32.totalorder %s29_s27, %s29_s27 }
  0x1b   :  { %p867_p11 = scmp.ne.s32.totalorder %s29_s27, %s866_s8  ;;  %p872_p13 = scmp.lt.s32.totalorder %s866_s8, %s866_s8 }
  0x1d   :  { %p873_p0 = por %p872_p13, %p871_p12 }
  0x1f   :  { %p874_p1 = pnand %p873_p0, %p867_p11 }
  0x21   :  { %877 = shalt.err (!%p874_p1)
}
  0x22   :  { %s910_s0 = smov 128   ;;  %s911_s9 = smov 8  }
  0x23   :  { %34 = dma.hbm_to_vmem [thread:$0]  %s1042_s1, 512, %s29_s27, [#allocation7], %s910_s0, %s910_s0, %s911_s9  }
  0x24   :  { %900 = dma.done.wait [#allocation4], 2048  }
  0x25   :  { %901 = vsyncadd [#allocation4], 4294965248 }
  0x26   :  { %902 = dma.done.wait [#allocation7], 512  }
  0x27   :  { %903 = vsyncadd [#allocation7], 4294966784  ;;  %v57_v0 = vld [vmem:[#allocation3 + $0x40] sm:$0xff]  ;;  %v58_v1 = vld [vmem:[#allocation3 + $0x48] sm:$0xff]  ;;  %vm47_vm0 = vcmask 254976   ;;  %v912_v24 = vmov 0.0   ;;  %v98_v58 = vlaneseq }
  0x28   :  { %v49_v2 = vld [vmem:[#allocation3] sm:$0xff]  ;;  %v78_v3 = vadd.f32 %v58_v1, %v57_v0  ;;  %v50_v4 = vld [vmem:[#allocation3 + $0x8] sm:$0xff]  ;;  %v59_v5 = vld [vmem:[#allocation3 + $0x50] sm:$0xff]  ;;  %48 = vst.msk [vmem:[#allocation2] sm:$0x3] %vm47_vm0, %v912_v24  ;;  %v913_v28 = vmov 0.0|0.0  }
  0x29   :  { %v60_v6 = vld [vmem:[#allocation3 + $0x58] sm:$0xff]  ;;  %v66_v7 = vadd.f32 %v50_v4, %v49_v2  ;;  %v51_v8 = vld [vmem:[#allocation3 + $0x10] sm:$0xff]  ;;  %v61_v12 = vld [vmem:[#allocation3 + $0x60] sm:$0xff]  ;;  %792 = vmatprep.subr.bf16.mxu0 %v913_v28  ;;  %774 = vmatprep.subr.bf16.mxu1 %v913_v28  ;;  %vm914_vm1 = vmmov 0   ;;  %v99_v59 = vand.u32 127, %v98_v58  ;;  %v101_v0 = vshrl.u32 %v98_v58, 7 }
  0x2a   :  { %v52_v9 = vld [vmem:[#allocation3 + $0x18] sm:$0xff]  ;;  %79 = vadd.xlane.f32.xlu1 %v78_v3  ;;  %v81_v10 = vadd.f32 %v60_v6, %v59_v5  ;;  %v62_v13 = vld [vmem:[#allocation3 + $0x68] sm:$0xff]  ;;  %v53_v14 = vld [vmem:[#allocation3 + $0x20] sm:$0xff]  ;;  %749 = vmatprep.mubr.msk.f32.mxu0 %vm914_vm1, %v912_v24  ;;  %vm109_vm2 = vcmask 130112   ;;  %vm116_vm3 = vcmask 195712   ;;  %vm123_vm4 = vcmask 261312  }
  0x2b   :  { %67 = vadd.xlane.f32.xlu0 %v66_v7  ;;  %v69_v11 = vadd.f32 %v52_v9, %v51_v8  ;;  %v54_v15 = vld [vmem:[#allocation3 + $0x28] sm:$0xff]  ;;  %v84_v16 = vadd.f32 %v62_v13, %v61_v12  ;;  %v63_v18 = vld [vmem:[#allocation3 + $0x70] sm:$0xff]  ;;  %v64_v19 = vld [vmem:[#allocation3 + $0x78] sm:$0xff]  ;;  %716 = vmatprep.mubr.msk.f32.mxu1 %vm914_vm1, %v912_v24  ;;  %v104_v62 = vadd.s32 4294967288, %v99_v59  ;;  %v111_v63 = vadd.s32 4294967280, %v99_v59  ;;  %s915_s13 = smov [#allocation8]  }
  0x2c   :  { %v72_v17 = vadd.f32 %v54_v15, %v53_v14  ;;  %v55_v20 = vld [vmem:[#allocation3 + $0x30] sm:$0xff]  ;;  %v56_v21 = vld [vmem:[#allocation3 + $0x38] sm:$0xff]  ;;  %v87_v22 = vadd.f32 %v64_v19, %v63_v18  ;;  %v154_v25 = vld [vmem:[#allocation6] sm:$0xff]  ;;  %v118_v4 = vadd.s32 4294967272, %v99_v59  ;;  %v102_v6 = vsub.s32 %v99_v59, %v101_v0  ;;  %s667_s14 = sshll.u32 %s915_s13, 4  ;;  %s668_s14 = int_to_ptr.vmem [resolvable:$true] %s667_s14 }
  0x2d   :  { %v75_v23 = vadd.f32 %v56_v21, %v55_v20  ;;  %v155_v26 = vld [vmem:[#allocation6 + $0x8] sm:$0xff]  ;;  %v156_v27 = vld [vmem:[#allocation6 + $0x10] sm:$0xff]  ;;  %v170_v29 = vand.u32 4294901760, %v154_v25  ;;  %v157_v31 = vld [vmem:[#allocation6 + $0x18] sm:$0xff]  ;;  %v107_v2 = vsub.s32 %v104_v62, %v101_v0  ;;  %v114_v5 = vsub.s32 %v111_v63, %v101_v0  ;;  %s878_s15 = scalar_lea.vmem %s668_s14, 32  ;;  %p883_p3 = scmp.lt.s32.totalorder %s668_s14, %s668_s14 }
  0x2e   :  { %82 = vadd.xlane.f32.xlu1 %v81_v10  ;;  %v173_v30 = vand.u32 4294901760, %v155_v26  ;;  %v176_v32 = vand.u32 4294901760, %v156_v27  ;;  %v179_v33 = vand.u32 4294901760, %v157_v31  ;;  %v121_v10 = vsub.s32 %v118_v4, %v101_v0  ;;  %p879_p2 = scmp.ne.s32.totalorder %s668_s14, %s878_s15  ;;  %p884_p4 = scmp.lt.s32.totalorder %s878_s15, %s878_s15 }
  0x2f   :  { %70 = vadd.xlane.f32.xlu0 %v69_v11  ;;  %v970_v35 = vsub.f32 %v154_v25, %v170_v29  ;;  %vm144_vm5 = vcmask 1041409   ;;  %vm165_vm6 = vcmask 261120  }
  0x30   :  { %v968_v34 = vpack.c.bf16 %v173_v30, %v170_v29  ;;  %v972_v36 = vsub.f32 %v155_v26, %v173_v30  ;;  %v974_v37 = vsub.f32 %v156_v27, %v176_v32  ;;  %v976_v38 = vsub.f32 %v157_v31, %v179_v33  ;;  %v65_v26 = vld [vmem:[#allocation2] sm:$0x3]  ;;  %p885_p5 = por %p884_p4, %p883_p3 }
  0x31   :  { %v980_v39 = vpack.c.bf16 %v179_v33, %v176_v32  ;;  %v251_v40 = vand.u32 4294901760, %v970_v35 }
  0x32   :  { %85 = vadd.xlane.f32.xlu1 %v84_v16  ;;  %794 = vmatpush3.bf16.msra.mxu0 %v968_v34  ;;  %v258_v41 = vand.u32 4294901760, %v972_v36  ;;  %v265_v47 = vand.u32 4294901760, %v974_v37  ;;  %v272_v48 = vand.u32 4294901760, %v976_v38  ;;  %v787_v56 = vpack.c.bf16 %v972_v36, %v970_v35  ;;  %p886_p6 = pnand %p885_p5, %p879_p2 }
  0x33   :  { %73 = vadd.xlane.f32.xlu0 %v72_v17  ;;  %776 = vmatpush3.bf16.msra.mxu1 %v968_v34  ;;  %v252_v43 = vsub.f32 %v970_v35, %v251_v40  ;;  %v790_v57 = vpack.c.bf16 %v976_v38, %v974_v37  ;;  %v677_v35 = vld [vmem:[%s1043_s2] ss:$0 sm:$0xff] }
  0x34   :  { %795 = vmatprep.subr.bf16.mxu0 %v913_v28  ;;  %777 = vmatprep.subr.bf16.mxu1 %v913_v28  ;;  %v990_v42 = vpack.c.bf16 %v258_v41, %v251_v40  ;;  %v259_v44 = vsub.f32 %v972_v36, %v258_v41  ;;  %v802_v50 = vpack.c.bf16 %v272_v48, %v265_v47 }
  0x35   :  { %v253_v45 = vand.u32 4294901760, %v252_v43  ;;  %v266_v51 = vsub.f32 %v974_v37, %v265_v47  ;;  %v273_v52 = vsub.f32 %v976_v38, %v272_v48 }
  0x36   :  { %88 = vadd.xlane.f32.xlu1 %v87_v22  ;;  %797 = vmatpush3.bf16.msra.mxu0 %v980_v39  ;;  %v260_v46 = vand.u32 4294901760, %v259_v44 }
  0x37   :  { %76 = vadd.xlane.f32.xlu0 %v75_v23  ;;  %779 = vmatpush3.bf16.msra.mxu1 %v980_v39  ;;  %v267_v53 = vand.u32 4294901760, %v266_v51  ;;  %v274_v54 = vand.u32 4294901760, %v273_v52 }
  0x38   :  { %798 = vmatprep.subr.bf16.mxu0 %v913_v28  ;;  %780 = vmatprep.subr.bf16.mxu1 %v913_v28  ;;  %v781_v49 = vpack.c.bf16 %v260_v46, %v253_v45 }
  0x39   :  { %v784_v55 = vpack.c.bf16 %v274_v54, %v267_v53 }
  0xb7   :  { %v80_v60 = vpop.xlane.xlu1 %79 }
  0xb8   :  { %v68_v61 = vpop.xlane.xlu0 %67  ;;  %v128_v13 = vrot.slane %v80_v60, %v102_v6 }
  0xb9   :  { %v103_v15 = vrot.slane %v68_v61, %v102_v6 }
  0xbb   :  { %v83_v1 = vpop.xlane.xlu1 %82 }
  0xbc   :  { %v71_v3 = vpop.xlane.xlu0 %70  ;;  %v132_v8 = vrot.slane %v83_v1, %v107_v2 }
  0xbd   :  { %v108_v11 = vrot.slane %v71_v3, %v107_v2 }
  0xbe   :  { %v133_v17 = vsel %vm109_vm2, %v132_v8, %v128_v13 }
  0xbf   :  { %v86_v7 = vpop.xlane.xlu1 %85  ;;  %v110_v20 = vsel %vm109_vm2, %v108_v11, %v103_v15 }
  0xc0   :  { %v74_v9 = vpop.xlane.xlu0 %73  ;;  %v137_v12 = vrot.slane %v86_v7, %v114_v5 }
  0xc1   :  { %v115_v14 = vrot.slane %v74_v9, %v114_v5 }
  0xc2   :  { %v138_v21 = vsel %vm116_vm3, %v137_v12, %v133_v17 }
  0xc3   :  { %v89_v16 = vpop.xlane.xlu1 %88  ;;  %v117_v23 = vsel %vm116_vm3, %v115_v14, %v110_v20 }
  0xc4   :  { %v142_v18 = vrot.slane %v89_v16, %v121_v10  ;;  %v77_v19 = vpop.xlane.xlu0 %76 }
  0xc5   :  { %v122_v22 = vrot.slane %v77_v19, %v121_v10 }
  0xc6   :  { %v143_v25 = vsel %vm123_vm4, %v142_v18, %v138_v21 }
  0xc7   :  { %v124_v27 = vsel %vm123_vm4, %v122_v22, %v117_v23 }
  0xc8   :  { %v145_v29 = vsel %vm144_vm5, %v143_v25, %v124_v27 }
  0xc9   :  { %v147_v30 = vadd.f32 %v145_v29, %v65_v26 }
  0xcb   :  { %149 = vst.msk [vmem:[#allocation2] sm:$0x3] %vm47_vm0, %v147_v30 }
  0xd2   :  { %v153_v31 = vld [vmem:[#allocation2] sm:$0x3] }
  0xd3   :  { %v167_v32 = vsel %vm165_vm6, %v153_v31, 0 }
  0xd4   :  { %v238_v33 = vand.u32 4294901760, %v167_v32 }
  0xd6   :  { %v239_v40 = vsub.f32 %v167_v32, %v238_v33 }
  0xd8   :  { %v240_v41 = vand.u32 4294901760, %v239_v40 }
  0xda   :  { %750 = vmatmul.mubr.f32.vlgmr.msra.gmra.mrb[0].mxu0 %v240_v41  ;;  %v241_v43 = vsub.f32 %v239_v40, %v240_v41 }
  0xdb   :  { %800 = vmatpush3.bf16.msra.mxu0 %v990_v42  ;;  %760 = vmatprep.mubr.msk.f32.mxu0 %vm914_vm1, %v912_v24 }
  0xdc   :  { %v242_v44 = vand.u32 4294901760, %v241_v43  ;;  %801 = vmatprep.subr.bf16.mxu0 %v913_v28 }
  0xde   :  { %717 = vmatmul.mubr.f32.vlgmr.msra.gmra.mrb[0].mxu1 %v242_v44 }
  0xdf   :  { %782 = vmatpush3.bf16.msra.mxu1 %v781_v49  ;;  %803 = vmatpush3.bf16.msra.mxu0 %v802_v50 }
  0xe0   :  { %783 = vmatprep.subr.bf16.mxu1 %v913_v28  ;;  %804 = vmatprep.subr.bf16.mxu0 %v913_v28 }
  0xe1   :  { %727 = vmatprep.mubr.msk.f32.mxu1 %vm914_vm1, %v912_v24 }
  0xe2   :  { %761 = vmatmul.mubr.f32.vlgmr.msra.gmra.mrb[0].mxu0 %v238_v33 }
  0xe3   :  { %785 = vmatpush3.bf16.msra.mxu1 %v784_v55  ;;  %806 = vmatpush3.bf16.msra.mxu0 %v968_v34 }
  0xe4   :  { %786 = vmatprep.subr.bf16.mxu1 %v913_v28  ;;  %807 = vmatprep.subr.bf16.mxu0 %v913_v28 }
  0xe5   :  { %771 = vmatprep.mubr.msk.f32.mxu0 %vm914_vm1, %v912_v24 }
  0xe6   :  { %728 = vmatmul.mubr.f32.vlgmr.msra.gmra.mrb[0].mxu1 %v238_v33 }
  0xe7   :  { %788 = vmatpush3.bf16.msra.mxu1 %v787_v56  ;;  %809 = vmatpush3.bf16.msra.mxu0 %v980_v39 }
  0xe8   :  { %789 = vmatprep.subr.bf16.mxu1 %v913_v28  ;;  %738 = vmatprep.mubr.msk.f32.mxu1 %vm914_vm1, %v912_v24 }
  0xea   :  { %772 = vmatmul.mubr.f32.vlgmr.msra.gmra.mrb[0].mxu0 %v238_v33 }
  0xeb   :  { %791 = vmatpush3.bf16.msra.mxu1 %v790_v57 }
  0xee   :  { %739 = vmatmul.mubr.f32.vlgmr.msra.gmra.mrb[0].mxu1 %v239_v40 }
 0x1bd   :  { %v650_v34 = vpop.f32.mrb[0].mxu0 }
 0x1be   :  { %v773_v42 = vpop.f32.mrb[1].mxu0 }
 0x1c1   :  { %v415_v36 = vpop.f32.mrb[0].mxu1 }
 0x1c2   :  { %v810_v45 = vadd.f32 %v677_v35, %v415_v36  ;;  %v740_v39 = vpop.f32.mrb[1].mxu1 }
 0x1c4   :  { %v811_v46 = vadd.f32 %v810_v45, %v650_v34 }
 0x1c6   :  { %v654_v28 = vsub.f32 0.0, %v811_v46 }
 0x1c8   :  { %v655_v47 = vmul.f32 1.442695, %v654_v28 }
 0x1ca   :  { %830 = vpow2.f32 %v655_v47 }
 0x1d4   :  { %v831_v24 = vpop.eup %830 }
 0x1d5   :  { %v657_v48 = vadd.f32 1.0, %v831_v24 }
 0x1d7   :  { %832 = vrcp.f32 %v657_v48 }
 0x1e1   :  { %v833_v37 = vpop.eup %832 }
 0x1e2   :  { %660 = vst [vmem:[#allocation8] sm:$0x3] %v833_v37 }
 0x1e3   :  { %889 = shalt.err (!%p886_p6)
}
 0x1e4   :  { %s890_s17 = scalar_lea.hbm %s1044_s3, 32 }
 0x1e5   :  { %p891_p7 = scmp.ne.s32.totalorder %s1044_s3, %s890_s17  ;;  %p894_p8 = scmp.lt.u32.totalorder %s890_s17, %s1044_s3 }
 0x1e7   :  { %p896_p9 = pnand %p894_p8, %p891_p7 }
 0x1e9   :  { %899 = shalt.err (!%p896_p9)
}
 0x1ea   :  { %670 = dma.vmem_to_hbm [thread:$0]  %s668_s14, 32, %s1044_s3, [#allocation5]  }
 0x1eb   :  { %904 = dma.done.wait [#allocation5], 32  }
 0x1ec   :  { %905 = vsyncadd [#allocation5], 4294967264 }
 0x1ed   :  { %674 = vsyncpa [#allocation4], 1 }
 0x1ee   :  { %675 = vsyncpa [#allocation7], 1 }
 0x1ef   :  { %676 = vsyncpa [#allocation5], 1 }

</bundles_post_ra>
